<compile_context>
chip_gen: v5e
topology: v5e:2x2
jax: 0.10.0
libtpu: 0.0.40
codegen_flags: <defaults>
</compile_context>

<pallas_src>
import functools

import jax
import jax.numpy as jnp
import numpy as np
from jax.experimental import pallas as pl
from jax.experimental.pallas import tpu as pltpu


def _vmem_limit_bytes():
    """Generation-aware VMEM budget: physical capacity minus headroom."""
    cap = 64 << 20
    try:
        cap = int(pltpu.get_tpu_info().vmem_capacity_bytes)
    except Exception:
        pass
    return int(min(max(cap - (8 << 20), 32 << 20), 112 << 20))


def _pick_tile(n, pref):
    """Largest multiple-of-8 tile <= pref that divides n, else n (full dim)."""
    if n <= pref:
        return n
    for t in range(pref, 7, -8):
        if n % t == 0:
            return t
    return n


# ------------------------------ kernels --------------------------------------

def _qkv_proj_kernel(x_ref, w_ref, b_ref, q_ref, k_ref, v_ref):
    # x_ref: (ts, D) bf16 ; w_ref: (3, D, D) bf16 ; b_ref: (3, 1, D) f32
    # Three contraction-D MXU matmuls; q weights/bias are pre-scaled on host.
    x = x_ref[...]
    outs = (q_ref, k_ref, v_ref)
    for i in range(3):
        acc = jnp.dot(x, w_ref[i], preferred_element_type=jnp.float32)
        acc = acc + b_ref[i]
        outs[i][...] = acc.astype(outs[i].dtype)


def _attention_kernel(*refs, num_heads, head_dim, has_mask):
    if has_mask:
        mask_ref, q_ref, k_ref, v_ref, wo_ref, bo_ref, o_ref = refs
    else:
        q_ref, k_ref, v_ref, wo_ref, bo_ref, o_ref = refs
        mask_ref = None

    q = q_ref[0]                       # (tq, D) bf16, pre-scaled by 1/sqrt(hd)
    k = k_ref[0]                       # (S,  D) bf16
    v = v_ref[0]                       # (S,  D) bf16
    mask = mask_ref[0] if has_mask else None    # (tq, S) f32, broadcast over H

    ctx_parts = []
    for h in range(num_heads):         # static unrolled loop, static lane slices
        lo = h * head_dim
        qh = q[:, lo:lo + head_dim]    # (tq, hd)
        kh = k[:, lo:lo + head_dim]    # (S,  hd)
        vh = v[:, lo:lo + head_dim]    # (S,  hd)

        s = jax.lax.dot_general(qh, kh, (((1,), (1,)), ((), ())),
                                preferred_element_type=jnp.float32)  # (tq, S)
        if has_mask:
            s = s + mask
        # Numerically-stable softmax in f32; EUP approx reciprocal for denom.
        s = s - jnp.max(s, axis=-1, keepdims=True)
        p = jnp.exp(s)
        p = p * pl.reciprocal(jnp.sum(p, axis=-1, keepdims=True), approx=True)

        ctx_parts.append(
            jnp.dot(p.astype(jnp.bfloat16), vh,
                    preferred_element_type=jnp.float32).astype(jnp.bfloat16))

    ctx = jnp.concatenate(ctx_parts, axis=-1)            # (tq, D) bf16
    # Fused out-projection: single MXU matmul contracting over the full D.
    out = jnp.dot(ctx, wo_ref[...], preferred_element_type=jnp.float32)
    out = out + bo_ref[0]
    o_ref[0] = out.astype(o_ref.dtype)


# ------------------------------ wrappers --------------------------------------

def _qkv_projection(x2d, w3, b3):
    T, D = x2d.shape
    ts = _pick_tile(T, 512)
    out_sds = jax.ShapeDtypeStruct((T, D), jnp.bfloat16)
    return pl.pallas_call(
        _qkv_proj_kernel,
        out_shape=(out_sds, out_sds, out_sds),
        grid_spec=pltpu.PrefetchScalarGridSpec(
            num_scalar_prefetch=0,
            grid=(pl.cdiv(T, ts),),
            in_specs=[
                pl.BlockSpec((ts, D), lambda t: (t, 0)),
                pl.BlockSpec((3, D, D), lambda t: (0, 0, 0)),
                pl.BlockSpec((3, 1, D), lambda t: (0, 0, 0)),
            ],
            out_specs=(pl.BlockSpec((ts, D), lambda t: (t, 0)),) * 3,
        ),
        compiler_params=pltpu.CompilerParams(
            dimension_semantics=("parallel",),
            vmem_limit_bytes=_vmem_limit_bytes()),
    )(x2d, w3, b3)


def _attention_core(q, k, v, wo, bo, mask, out_dtype, *, num_heads):
    B, S, D = q.shape
    hd = D // num_heads
    tq = _pick_tile(S, 256)
    grid = (B, pl.cdiv(S, tq))
    has_mask = mask is not None

    kernel = functools.partial(_attention_kernel, num_heads=num_heads,
                               head_dim=hd, has_mask=has_mask)

    in_specs, args = [], []
    if has_mask:
        if mask.shape[0] == 1:
            # Broadcastable mask: never expanded to (B, S, S); block 0 reused.
            midx = lambda b, qi: (0, qi, 0)
        else:
            midx = lambda b, qi: (b, qi, 0)
        in_specs.append(pl.BlockSpec((1, tq, S), midx))
        args.append(mask)
    in_specs += [
        pl.BlockSpec((1, tq, D), lambda b, qi: (b, qi, 0)),   # q tile
        pl.BlockSpec((1, S, D), lambda b, qi: (b, 0, 0)),     # k (full seq)
        pl.BlockSpec((1, S, D), lambda b, qi: (b, 0, 0)),     # v (full seq)
        pl.BlockSpec((D, D), lambda b, qi: (0, 0)),           # Wo
        pl.BlockSpec((1, D), lambda b, qi: (0, 0)),           # bo
    ]
    args += [q, k, v, wo, bo]

    return pl.pallas_call(
        kernel,
        out_shape=jax.ShapeDtypeStruct((B, S, D), out_dtype),
        grid_spec=pltpu.PrefetchScalarGridSpec(
            num_scalar_prefetch=0,
            grid=grid,
            in_specs=in_specs,
            out_specs=pl.BlockSpec((1, tq, D), lambda b, qi: (b, qi, 0)),
        ),
        compiler_params=pltpu.CompilerParams(
            dimension_semantics=("parallel", "parallel"),
            vmem_limit_bytes=_vmem_limit_bytes()),
    )(*args)


def prepare_clip_attention_params(params, *, num_heads):
    """One-time weight preparation (hoisted out of the per-call path)."""
    D = params["wq"].shape[0]
    hd = D // num_heads
    if hd * num_heads != D:
        raise ValueError("embed_dim must be divisible by num_heads")
    scale = hd ** -0.5
    # Fold 1/sqrt(hd) into Wq/bq; stack q/k/v weights so they live in one
    # resident VMEM buffer during the projection kernel.
    w3 = jnp.stack([params["wq"] * scale, params["wk"], params["wv"]],
                   axis=0).astype(jnp.bfloat16)                 # (3, D, D)
    b3 = jnp.stack([params["bq"] * scale, params["bk"], params["bv"]],
                   axis=0).astype(jnp.float32)                  # (3, 1, D)
    return {"wqkv": w3, "bqkv": b3,
            "wo": params["wo"].astype(jnp.bfloat16),
            "bo": params["bo"].astype(jnp.float32)}


def clip_attention(hidden, prepared, attention_mask=None,
                   causal_attention_mask=None, *, num_heads):
    """Mirrors CLIPAttention.forward (eval mode). Masks are additive with
    shape (B, 1, S, S) or (1, 1, S, S) (broadcast over heads / batch).

    Returns (attn_output, None) — output_attentions=False path.
    """
    # TODO(synk): attention dropout (training=True) and output_attentions=True
    # (materializing per-head probabilities) are not implemented.
    B, S, D = hidden.shape
    if D % num_heads != 0:
        raise ValueError("embed_dim must be divisible by num_heads")

    # Token-flattened bf16 input; QKV kernel emits lane-dense (T, D) q/k/v.
    x2d = hidden.reshape(B * S, D).astype(jnp.bfloat16)
    q2, k2, v2 = _qkv_projection(x2d, prepared["wqkv"], prepared["bqkv"])
    q = q2.reshape(B, S, D)     # metadata-only reshapes, no HBM pass
    k = k2.reshape(B, S, D)
    v = v2.reshape(B, S, D)

    mask = None
    if attention_mask is not None or causal_attention_mask is not None:
        m = None
        for extra in (causal_attention_mask, attention_mask):
            if extra is not None:
                assert extra.ndim == 4 and extra.shape[1] == 1 \
                    and extra.shape[2] == S and extra.shape[3] == S, \
                    "masks must be (B or 1, 1, S, S)"
                e = extra.astype(jnp.float32)
                m = e if m is None else m + e
        mask = m[:, 0]                                         # (B or 1, S, S)

    out = _attention_core(q, k, v, prepared["wo"], prepared["bo"], mask,
                          hidden.dtype, num_heads=num_heads)
    return out, None


# --------------------------- pure-JAX reference -------------------------------

def clip_attention_ref(hidden, params, attention_mask=None,
                       causal_attention_mask=None, *, num_heads):
    """Reference for CLIPAttention.forward (eval) using the same bf16-operand /
    f32-accumulate casts as the kernel."""
    B, S, D = hidden.shape
    hd = D // num_heads
    scale = hd ** -0.5
    bf16, f32 = jnp.bfloat16, jnp.float32

    x = hidden.astype(bf16)
    wq = (params["wq"] * scale).astype(bf16)
    bq = params["bq"][0] * scale
    q = (jnp.dot(x, wq, preferred_element_type=f32) + bq).astype(bf16)
    k = (jnp.dot(x, params["wk"].astype(bf16), preferred_element_type=f32)
         + params["bk"][0]).astype(bf16)
    v = (jnp.dot(x, params["wv"].astype(bf16), preferred_element_type=f32)
         + params["bv"][0]).astype(bf16)

    def heads(t):
        return t.reshape(B, S, num_heads, hd).transpose(0, 2, 1, 3)

    qh, kh, vh = heads(q), heads(k), heads(v)
    scores = jnp.einsum("bhqd,bhkd->bhqk", qh, kh, preferred_element_type=f32)
    if causal_attention_mask is not None:
        scores = scores + causal_attention_mask.astype(f32)
    if attention_mask is not None:
        scores = scores + attention_mask.astype(f32)
    p = jax.nn.softmax(scores, axis=-1)
    ctx = jnp.einsum("bhqk,bhkd->bhqd", p.astype(bf16), vh,
                     preferred_element_type=f32)
    ctx = ctx.transpose(0, 2, 1, 3).reshape(B, S, D)
    out = (jnp.dot(ctx.astype(bf16), params["wo"].astype(bf16),
                   preferred_element_type=f32) + params["bo"][0])
    return out.astype(hidden.dtype)


# ---------------------------------- main ---------------------------------------

def make_params(key, D):
    ks = jax.random.split(key, 8)
    s = D ** -0.5
    def w(k):
        return s * jax.random.normal(k, (D, D), jnp.float32)
    def b(k):
        return 0.02 * jax.random.normal(k, (1, D), jnp.float32)
    return {
        # Stored as (in, out): y = x @ W + b  (== nn.Linear with W_torch = W.T)
        "wq": w(ks[0]), "bq": b(ks[1]),
        "wk": w(ks[2]), "bk": b(ks[3]),
        "wv": w(ks[4]), "bv": b(ks[5]),
        "wo": w(ks[6]), "bo": b(ks[7]),
    }


if __name__ == "__main__":
    # Small config: batch=2, seq=8, hidden=32, heads=4 (head_dim=8).
    B, S, D, H = 2, 8, 32, 4

    key = jax.random.PRNGKey(0)
    k_x, k_p = jax.random.split(key)
    hidden = jax.random.normal(k_x, (B, S, D), jnp.float32)
    params = make_params(k_p, D)
    prepared = prepare_clip_attention_params(params, num_heads=H)

    # Additive causal mask (PyTorch convention, (B,1,S,S)).
    causal = np.triu(np.full((S, S), -1e9, np.float32), k=1)
    causal_mask = jnp.asarray(np.broadcast_to(causal, (B, 1, S, S)))

    # Additive padding mask: last two key positions of batch 1 masked out.
    attn_mask = np.zeros((B, 1, S, S), np.float32)
    attn_mask[1, 0, :, -2:] = -1e9
    attn_mask = jnp.asarray(attn_mask)

    # masked path (causal + padding)
    out, _ = clip_attention(hidden, prepared, attention_mask=attn_mask,
                            causal_attention_mask=causal_mask, num_heads=H)
    out = jax.block_until_ready(out)
    ref = clip_attention_ref(hidden, params, attention_mask=attn_mask,
                             causal_attention_mask=causal_mask, num_heads=H)
    np.testing.assert_allclose(np.asarray(out), np.asarray(ref),
                               rtol=1e-2, atol=1e-2)

    # mask-free path (no dense mask is built or DMA'd)
    out2, _ = clip_attention(hidden, prepared, num_heads=H)
    out2 = jax.block_until_ready(out2)
    ref2 = clip_attention_ref(hidden, params, num_heads=H)
    np.testing.assert_allclose(np.asarray(out2), np.asarray(ref2),
                               rtol=1e-2, atol=1e-2)

    print("KERNEL_OK")
</pallas_src>

<mosaic_0001>
module attributes {stable_mosaic.version = 11 : i64} {
  func.func @_qkv_proj_kernel(%arg0: i32, %arg1: memref<16x32xbf16, #tpu.memory_space<vmem>>, %arg2: memref<3x32x32xbf16, #tpu.memory_space<vmem>>, %arg3: memref<3x1x32xf32, #tpu.memory_space<vmem>>, %arg4: memref<16x32xbf16, #tpu.memory_space<vmem>>, %arg5: memref<16x32xbf16, #tpu.memory_space<vmem>>, %arg6: memref<16x32xbf16, #tpu.memory_space<vmem>>) attributes {dimension_semantics = [#tpu.dimension_semantics<parallel>], iteration_bounds = array<i64: 1>, scalar_prefetch = 0 : i64, scratch_operands = 0 : i64, tpu.core_type = #tpu.core_type<tc>, window_params = [{transform_indices = @transform_0, window_bounds = array<i64: 16, 32>}, {pipeline_mode = #tpu.pipeline_mode<synchronous>, transform_indices = @transform_1, window_bounds = array<i64: 3, 32, 32>}, {pipeline_mode = #tpu.pipeline_mode<synchronous>, transform_indices = @transform_2, window_bounds = array<i64: 3, 1, 32>}, {transform_indices = @transform_3, window_bounds = array<i64: 16, 32>}, {transform_indices = @transform_4, window_bounds = array<i64: 16, 32>}, {transform_indices = @transform_5, window_bounds = array<i64: 16, 32>}]} {
    %c0 = arith.constant 0 : index
    %c0_0 = arith.constant 0 : index
    %0 = vector.load %arg1[%c0, %c0_0] : memref<16x32xbf16, #tpu.memory_space<vmem>>, vector<16x32xbf16>
    %c0_1 = arith.constant 0 : index
    %c0_2 = arith.constant 0 : index
    %c0_3 = arith.constant 0 : index
    %1 = vector.load %arg2[%c0_1, %c0_2, %c0_3] : memref<3x32x32xbf16, #tpu.memory_space<vmem>>, vector<1x32x32xbf16>
    %2 = vector.shape_cast %1 : vector<1x32x32xbf16> to vector<32x32xbf16>
    %cst = arith.constant dense<0.000000e+00> : vector<16x32xf32>
    %3 = tpu.matmul %0, %2, %cst {dimension_numbers = #tpu.dot_dimension_numbers<[1], [0], [0], [1], [0, 0, 1, 1], [], []>} : vector<16x32xbf16>, vector<32x32xbf16>, vector<16x32xf32> -> vector<16x32xf32>
    %c0_4 = arith.constant 0 : index
    %c0_5 = arith.constant 0 : index
    %c0_6 = arith.constant 0 : index
    %4 = vector.load %arg3[%c0_4, %c0_5, %c0_6] : memref<3x1x32xf32, #tpu.memory_space<vmem>>, vector<1x1x32xf32>
    %5 = vector.shape_cast %4 : vector<1x1x32xf32> to vector<1x32xf32>
    %6 = vector.broadcast %5 : vector<1x32xf32> to vector<16x32xf32>
    %7 = arith.addf %3, %6 : vector<16x32xf32>
    %8 = arith.truncf %7 : vector<16x32xf32> to vector<16x32xbf16>
    %c0_7 = arith.constant 0 : index
    %c0_8 = arith.constant 0 : index
    %9 = vector.load %arg4[%c0_7, %c0_8] : memref<16x32xbf16, #tpu.memory_space<vmem>>, vector<16x32xbf16>
    tpu.vector_store %arg4[%c0_7, %c0_8], %8 {strides = array<i32>} : memref<16x32xbf16, #tpu.memory_space<vmem>>, vector<16x32xbf16>,
    %c1 = arith.constant 1 : index
    %c0_9 = arith.constant 0 : index
    %c0_10 = arith.constant 0 : index
    %10 = vector.load %arg2[%c1, %c0_9, %c0_10] : memref<3x32x32xbf16, #tpu.memory_space<vmem>>, vector<1x32x32xbf16>
    %11 = vector.shape_cast %10 : vector<1x32x32xbf16> to vector<32x32xbf16>
    %cst_11 = arith.constant dense<0.000000e+00> : vector<16x32xf32>
    %12 = tpu.matmul %0, %11, %cst_11 {dimension_numbers = #tpu.dot_dimension_numbers<[1], [0], [0], [1], [0, 0, 1, 1], [], []>} : vector<16x32xbf16>, vector<32x32xbf16>, vector<16x32xf32> -> vector<16x32xf32>
    %c1_12 = arith.constant 1 : index
    %c0_13 = arith.constant 0 : index
    %c0_14 = arith.constant 0 : index
    %13 = vector.load %arg3[%c1_12, %c0_13, %c0_14] : memref<3x1x32xf32, #tpu.memory_space<vmem>>, vector<1x1x32xf32>
    %14 = vector.shape_cast %13 : vector<1x1x32xf32> to vector<1x32xf32>
    %15 = vector.broadcast %14 : vector<1x32xf32> to vector<16x32xf32>
    %16 = arith.addf %12, %15 : vector<16x32xf32>
    %17 = arith.truncf %16 : vector<16x32xf32> to vector<16x32xbf16>
    %c0_15 = arith.constant 0 : index
    %c0_16 = arith.constant 0 : index
    %18 = vector.load %arg5[%c0_15, %c0_16] : memref<16x32xbf16, #tpu.memory_space<vmem>>, vector<16x32xbf16>
    tpu.vector_store %arg5[%c0_15, %c0_16], %17 {strides = array<i32>} : memref<16x32xbf16, #tpu.memory_space<vmem>>, vector<16x32xbf16>,
    %c2 = arith.constant 2 : index
    %c0_17 = arith.constant 0 : index
    %c0_18 = arith.constant 0 : index
    %19 = vector.load %arg2[%c2, %c0_17, %c0_18] : memref<3x32x32xbf16, #tpu.memory_space<vmem>>, vector<1x32x32xbf16>
    %20 = vector.shape_cast %19 : vector<1x32x32xbf16> to vector<32x32xbf16>
    %cst_19 = arith.constant dense<0.000000e+00> : vector<16x32xf32>
    %21 = tpu.matmul %0, %20, %cst_19 {dimension_numbers = #tpu.dot_dimension_numbers<[1], [0], [0], [1], [0, 0, 1, 1], [], []>} : vector<16x32xbf16>, vector<32x32xbf16>, vector<16x32xf32> -> vector<16x32xf32>
    %c2_20 = arith.constant 2 : index
    %c0_21 = arith.constant 0 : index
    %c0_22 = arith.constant 0 : index
    %22 = vector.load %arg3[%c2_20, %c0_21, %c0_22] : memref<3x1x32xf32, #tpu.memory_space<vmem>>, vector<1x1x32xf32>
    %23 = vector.shape_cast %22 : vector<1x1x32xf32> to vector<1x32xf32>
    %24 = vector.broadcast %23 : vector<1x32xf32> to vector<16x32xf32>
    %25 = arith.addf %21, %24 : vector<16x32xf32>
    %26 = arith.truncf %25 : vector<16x32xf32> to vector<16x32xbf16>
    %c0_23 = arith.constant 0 : index
    %c0_24 = arith.constant 0 : index
    %27 = vector.load %arg6[%c0_23, %c0_24] : memref<16x32xbf16, #tpu.memory_space<vmem>>, vector<16x32xbf16>
    tpu.vector_store %arg6[%c0_23, %c0_24], %26 {strides = array<i32>} : memref<16x32xbf16, #tpu.memory_space<vmem>>, vector<16x32xbf16>,
    return
  }
  func.func @transform_0(%arg0: i32) -> (i32, i32) {
    %c0_i32 = arith.constant 0 : i32
    %c0_i32_0 = arith.constant 0 : i32
    return %arg0, %c0_i32 : i32, i32
  }
  func.func @transform_1(%arg0: i32) -> (i32, i32, i32) {
    %c0_i32 = arith.constant 0 : i32
    %c0_i32_0 = arith.constant 0 : i32
    %c0_i32_1 = arith.constant 0 : i32
    %c0_i32_2 = arith.constant 0 : i32
    return %c0_i32, %c0_i32_0, %c0_i32_1 : i32, i32, i32
  }
  func.func @transform_2(%arg0: i32) -> (i32, i32, i32) {
    %c0_i32 = arith.constant 0 : i32
    %c0_i32_0 = arith.constant 0 : i32
    %c0_i32_1 = arith.constant 0 : i32
    %c0_i32_2 = arith.constant 0 : i32
    return %c0_i32, %c0_i32_0, %c0_i32_1 : i32, i32, i32
  }
  func.func @transform_3(%arg0: i32) -> (i32, i32) {
    %c0_i32 = arith.constant 0 : i32
    %c0_i32_0 = arith.constant 0 : i32
    return %arg0, %c0_i32 : i32, i32
  }
  func.func @transform_4(%arg0: i32) -> (i32, i32) {
    %c0_i32 = arith.constant 0 : i32
    %c0_i32_0 = arith.constant 0 : i32
    return %arg0, %c0_i32 : i32, i32
  }
  func.func @transform_5(%arg0: i32) -> (i32, i32) {
    %c0_i32 = arith.constant 0 : i32
    %c0_i32_0 = arith.constant 0 : i32
    return %arg0, %c0_i32 : i32, i32
  }
}

</mosaic_0001>

<bundles_post_ra>
// kernel: tpu_custom_call.1
= control target key start
LH: loop header
LB: loop body
LE: loop exit
PB: predicated region body
PF: predicated region fallthrough
CT: control target
= control target key end

     0   :  { %11 = vsyncpa [#allocation3], 0  ;;  %s534_s0 = inlined_call_operand.hbm [shape: bf16[16,32], index: 0, kind: input, shape index: {}]   ;;  %s535_s1 = inlined_call_operand.hbm [shape: bf16[3,32,32], index: 1, kind: input, shape index: {}]   ;;  %s536_s2 = inlined_call_operand.hbm [shape: f32[3,1,32], index: 2, kind: input, shape index: {}]   ;;  %s537_s3 = inlined_call_operand.hbm [shape: bf16[16,32], index: 3, kind: output, shape index: {0}]   ;;  %s538_s4 = inlined_call_operand.hbm [shape: bf16[16,32], index: 4, kind: output, shape index: {1}]   ;;  %s539_s5 = inlined_call_operand.hbm [shape: bf16[16,32], index: 5, kind: output, shape index: {2}]  }
   0x1   :  { %12 = vsyncpa [#allocation6], 0 }
   0x2   :  { %13 = vsyncpa [#allocation4], 0 }
   0x3   :  { %14 = vsyncpa [#allocation10], 0  ;;  %s32_s20 = sshll.u32 %s535_s1, 4  ;;  %s455_s21 = smov [#allocation5]   ;;  %s33_s20 = int_to_ptr.hbm [resolvable:$true] %s32_s20 }
   0x4   :  { %s34_s22 = sshll.u32 %s455_s21, 4  ;;  %s19_s25 = sshll.u32 %s534_s0, 4  ;;  %s35_s22 = int_to_ptr.vmem [resolvable:$true] %s34_s22  ;;  %s20_s25 = int_to_ptr.hbm [resolvable:$true] %s19_s25 }
   0x5   :  { %s456_s26 = smov 64   ;;  %s457_s27 = smov 4  }
   0x6   :  { %40 = dma.hbm_to_vmem [thread:$0]  %s33_s20, 768, %s35_s22, [#allocation6], %s456_s26, %s456_s26, %s457_s27  }
   0x7   :  { %s458_s28 = smov [#allocation2]   ;;  %s45_s1 = sshll.u32 %s536_s2, 4  ;;  %s46_s1 = int_to_ptr.hbm [resolvable:$true] %s45_s1 }
   0x8   :  { %s21_s29 = sshll.u32 %s458_s28, 4  ;;  %s459_s0 = smov [#allocation7]   ;;  %s22_s29 = int_to_ptr.vmem [resolvable:$true] %s21_s29 }
   0x9   :  { %27 = dma.hbm_to_vmem [thread:$0]  %s20_s25, 128, %s22_s29, [#allocation3], %s456_s26, %s456_s26, %s457_s27  }
   0xa   :  { %s47_s7 = sshll.u32 %s459_s0, 4  ;;  %s460_s8 = smov 16   ;;  %s48_s7 = int_to_ptr.vmem [resolvable:$true] %s47_s7 }
   0xb   :  { %s461_s9 = smov 1  }
   0xc   :  { %53 = dma.hbm_to_vmem [thread:$0]  %s46_s1, 48, %s48_s7, [#allocation6], %s460_s8, %s460_s8, %s461_s9  }
   0xd   :  { %447 = dma.done.wait [#allocation3], 128  }
   0xe   :  { %448 = vsyncadd [#allocation3], 4294967168 }
   0xf   :  { %449 = dma.done.wait [#allocation6], 816  }
  0x10   :  { %450 = vsyncadd [#allocation6], 4294966480  ;;  %v285_v0 = vld [vmem:[#allocation5 + $0x8] sm:$0xff]  ;;  %v287_v1 = vld [vmem:[#allocation5 + $0x18] sm:$0xff]  ;;  %vm94_vm0 = vcmask 261120   ;;  %vm114_vm1 = vcmask 257024  }
  0x11   :  { %v289_v2 = vld [vmem:[#allocation5 + $0x28] sm:$0xff]  ;;  %104 = vmatpush.bf16.msra.mxu0 %v285_v0  ;;  %145 = vmatpush.bf16.msra.mxu1 %v287_v1  ;;  %v284_v3 = vld [vmem:[#allocation5] sm:$0xff]  ;;  %v286_v4 = vld [vmem:[#allocation5 + $0x10] sm:$0xff]  ;;  %s462_s2 = smov [#allocation8]   ;;  %s203_s13 = sshll.u32 %s537_s3, 4  ;;  %s204_s13 = int_to_ptr.hbm [resolvable:$true] %s203_s13 }
  0x12   :  { %185 = vmatpush.bf16.msra.mxu2 %v289_v2  ;;  %v288_v5 = vld [vmem:[#allocation5 + $0x20] sm:$0xff]  ;;  %v283_v6 = vld [vmem:[#allocation2] sm:$0xff]  ;;  %v300_v7 = vld [vmem:[#allocation7] ss:$0 sm:$0xff]  ;;  %s201_s10 = sshll.u32 %s462_s2, 4  ;;  %s463_s14 = smov [#allocation9]   ;;  %s202_s10 = int_to_ptr.vmem [resolvable:$true] %s201_s10 }
  0x13   :  { %v301_v8 = vld [vmem:[#allocation7 + $0x1] ss:$0 sm:$0xff]  ;;  %v302_v15 = vld [vmem:[#allocation7 + $0x2] ss:$0 sm:$0xff]  ;;  %s214_s15 = sshll.u32 %s463_s14, 4  ;;  %s216_s18 = sshll.u32 %s538_s4, 4  ;;  %s215_s15 = int_to_ptr.vmem [resolvable:$true] %s214_s15  ;;  %s217_s18 = int_to_ptr.hbm [resolvable:$true] %s216_s18 }
  0x14   :  { %s464_s3 = smov [#allocation11]   ;;  %s229_s22 = sshll.u32 %s539_s5, 4  ;;  %s230_s22 = int_to_ptr.hbm [resolvable:$true] %s229_s22 }
  0x15   :  { %105 = vmatpush.bf16.msra.mxu0 %v284_v3  ;;  %146 = vmatpush.bf16.msra.mxu1 %v286_v4  ;;  %s227_s19 = sshll.u32 %s464_s3, 4  ;;  %s228_s19 = int_to_ptr.vmem [resolvable:$true] %s227_s19 }
  0x16   :  { %186 = vmatpush.bf16.msra.mxu2 %v288_v5 }
  0x18   :  { %264 = vmatmul.msk.bf16.vlgmr.msra.gmra.mxu0 %vm94_vm0, %v283_v6  ;;  %273 = vmatmul.msk.bf16.vlgmr.msra.gmra.mxu1 %vm94_vm0, %v283_v6 }
  0x19   :  { %282 = vmatmul.msk.bf16.vlgmr.msra.gmra.mxu2 %vm94_vm0, %v283_v6 }
  0x95   :  { %v107_v9 = vpop.f32.mrf.mxu0  ;;  %v148_v10 = vpop.f32.mrf.mxu1 }
  0x96   :  { %v108_v11 = vadd.f32 %v300_v7, %v107_v9  ;;  %v149_v12 = vadd.f32 %v301_v8, %v148_v10 }
  0x98   :  { %v112_v13 = vpack.c.bf16 %v108_v11, %v108_v11  ;;  %v153_v14 = vpack.c.bf16 %v149_v12, %v149_v12 }
  0x9a   :  { %115 = vst.msk [vmem:[#allocation8] sm:$0xf] %vm114_vm1, %v112_v13 }
  0x9b   :  { %155 = vst.msk [vmem:[#allocation9] sm:$0xf] %vm114_vm1, %v153_v14 }
  0x9c   :  { %v188_v16 = vpop.f32.mrf.mxu2 }
  0x9d   :  { %v189_v17 = vadd.f32 %v302_v15, %v188_v16  ;;  %v109_v18 = vpop.f32.mrf.mxu0  ;;  %v150_v19 = vpop.f32.mrf.mxu1 }
  0x9e   :  { %v110_v20 = vadd.f32 %v300_v7, %v109_v18  ;;  %v151_v21 = vadd.f32 %v301_v8, %v150_v19 }
  0x9f   :  { %v193_v22 = vpack.c.bf16 %v189_v17, %v189_v17 }
  0xa0   :  { %v113_v23 = vpack.c.bf16 %v110_v20, %v110_v20  ;;  %v154_v24 = vpack.c.bf16 %v151_v21, %v151_v21 }
  0xa1   :  { %195 = vst.msk [vmem:[#allocation11] sm:$0xf] %vm114_vm1, %v193_v22 }
  0xa2   :  { %116 = vst.msk [vmem:[#allocation8 + $0x4] sm:$0xf] %vm114_vm1, %v113_v23 }
  0xa3   :  { %156 = vst.msk [vmem:[#allocation9 + $0x4] sm:$0xf] %vm114_vm1, %v154_v24  ;;  %209 = dma.vmem_to_hbm [thread:$0]  %s202_s10, 128, %s204_s13, [#allocation4], %s456_s26, %s456_s26, %s457_s27  }
  0xa4   :  { %v190_v25 = vpop.f32.mrf.mxu2  ;;  %222 = dma.vmem_to_hbm [thread:$0]  %s215_s15, 128, %s217_s18, [#allocation10], %s456_s26, %s456_s26, %s457_s27  }
  0xa5   :  { %v191_v26 = vadd.f32 %v302_v15, %v190_v25 }
  0xa7   :  { %v194_v27 = vpack.c.bf16 %v191_v26, %v191_v26 }
  0xa9   :  { %196 = vst.msk [vmem:[#allocation11 + $0x4] sm:$0xf] %vm114_vm1, %v194_v27 }
  0xaa   :  { %235 = dma.vmem_to_hbm [thread:$0]  %s228_s19, 128, %s230_s22, [#allocation10], %s456_s26, %s456_s26, %s457_s27  }
  0xab   :  { %451 = dma.done.wait [#allocation4], 128  }
  0xac   :  { %452 = vsyncadd [#allocation4], 4294967168 }
  0xad   :  { %453 = dma.done.wait [#allocation10], 256  }
  0xae   :  { %454 = vsyncadd [#allocation10], 4294967040 }
  0xaf   :  { %248 = vsyncpa [#allocation3], 1 }
  0xb0   :  { %249 = vsyncpa [#allocation6], 1 }
  0xb1   :  { %250 = vsyncpa [#allocation4], 1 }
  0xb2   :  { %251 = vsyncpa [#allocation10], 1 }

</bundles_post_ra>
